<compile_context>
chip_gen: v5e
topology: v5e:2x2
jax: 0.10.0
libtpu: 0.0.40
codegen_flags: <defaults>
</compile_context>

<pallas_src>
import jax
import jax.numpy as jnp
from jax import lax
from jax.experimental import pallas as pl
from jax.experimental.pallas import tpu as pltpu


def _mlp_kernel(x_ref, w1_ref, w2t_ref, o_ref):
    # Cast to bf16 in VMEM (no extra HBM pass); MXU-native inputs, f32 accum.
    x = x_ref[...].astype(jnp.bfloat16)    # (TB, C) bf16
    w1 = w1_ref[...]                        # (H, C)  bf16  (native nn.Linear layout)
    w2t = w2t_ref[...]                      # (H, C)  bf16  (w2.T, lane-dense)

    # h = x @ w1.T  (contract C dims), f32 accumulation on the MXU.
    h = lax.dot_general(
        x, w1,
        dimension_numbers=(((1,), (1,)), ((), ())),
        preferred_element_type=jnp.float32,
    )                                              # (TB, H) f32
    h = jnp.maximum(h, 0.0)                        # ReLU in f32
    h = h.astype(jnp.bfloat16)                     # second dot stays on bf16 MXU path

    y = jnp.dot(h, w2t, preferred_element_type=jnp.float32)   # (TB, C) f32
    o_ref[...] = jax.nn.sigmoid(y).astype(o_ref.dtype)        # sigmoid in f32, emit bf16


def prepare_weights(w1, w2):
    """One-time weight prep (hoisted out of the per-call path).

    w1: (H, C) PyTorch nn.Linear (out, in) layout; w2: (C, H).
    Returns lane-dense bf16 (H, C) tensors for both matmuls.
    """
    return w1.astype(jnp.bfloat16), w2.T.astype(jnp.bfloat16)


def _choose_batch_tile(B, block_b):
    if B <= 16:
        return B                     # full-array block; no (8,128) divisibility needed
    tb = min(block_b, B)
    tb = max(16, (tb // 16) * 16)    # keep a multiple of 16 (bf16 sublane pack)
    # Guarantee >=2 grid steps so the batch can shard across v7x's two
    # TensorCores and the next tile's DMA overlaps the current compute.
    if pl.cdiv(B, tb) < 2:
        half = -(-B // 2)                      # ceil(B/2)
        half = ((half + 15) // 16) * 16        # round up to multiple of 16
        tb = min(tb, half)
    return tb


def mlp_forward(x, w1_b, w2t_b, *, block_b=2048, out_dtype=jnp.bfloat16):
    """x: (..., C) f32 (or bf16); w1_b/w2t_b: (H, C) bf16 from prepare_weights."""
    C = x.shape[-1]
    H = w1_b.shape[0]
    lead = x.shape[:-1]
    x2 = x.reshape(-1, C)
    B = x2.shape[0]

    TB = _choose_batch_tile(B, block_b)

    cost = pl.CostEstimate(
        flops=4 * B * H * C,                        # two matmuls, 2*B*H*C each
        transcendentals=B * C,                      # sigmoid
        bytes_accessed=(x2.size * x2.dtype.itemsize
                        + w1_b.size * 2 + w2t_b.size * 2
                        + B * C * jnp.dtype(out_dtype).itemsize),
    )

    out = pl.pallas_call(
        _mlp_kernel,
        out_shape=jax.ShapeDtypeStruct((B, C), out_dtype),
        grid_spec=pltpu.PrefetchScalarGridSpec(
            num_scalar_prefetch=0,
            grid=(pl.cdiv(B, TB),),
            in_specs=[
                pl.BlockSpec((TB, C), lambda i: (i, 0)),   # activations: tiled over B
                pl.BlockSpec((H, C), lambda i: (0, 0)),    # w1 resident across grid
                pl.BlockSpec((H, C), lambda i: (0, 0)),    # w2.T resident across grid
            ],
            out_specs=pl.BlockSpec((TB, C), lambda i: (i, 0)),
        ),
        compiler_params=pltpu.CompilerParams(
            dimension_semantics=("parallel",),             # shard batch tiles on v7x
        ),
        cost_estimate=cost,
    )(x2, w1_b, w2t_b)
    return out.reshape(*lead, C)


def reference_mlp_f32(x, w1, w2):
    # Exact PyTorch-semantics reference (f32 throughout).
    h = jnp.maximum(x @ w1.T, 0.0)
    return jax.nn.sigmoid(h @ w2.T)


def reference_mlp_bf16(x, w1, w2):
    # Mirrors the kernel's precision choices (bf16 matmul inputs, f32 accum).
    xb = x.astype(jnp.bfloat16)
    w1b, w2tb = prepare_weights(w1, w2)
    h = lax.dot_general(xb, w1b, dimension_numbers=(((1,), (1,)), ((), ())),
                        preferred_element_type=jnp.float32)
    h = jnp.maximum(h, 0.0).astype(jnp.bfloat16)
    y = jnp.dot(h, w2tb, preferred_element_type=jnp.float32)
    return jax.nn.sigmoid(y)


if __name__ == "__main__":
    # Shapes consistent with CBAM: channel=128, reduction=16 -> hidden=8.
    # B=512 gives a 2-step grid (TB=256) so pipelining / both-TC sharding are exercised.
    B, C, r = 512, 128, 16
    H = C // r

    key = jax.random.PRNGKey(0)
    kx, k1, k2 = jax.random.split(key, 3)

    x = jax.random.normal(kx, (B, C), dtype=jnp.float32)
    # deterministic synthetic weights (kaiming-uniform-ish scaling)
    w1 = jax.random.uniform(k1, (H, C), minval=-1.0, maxval=1.0,
                            dtype=jnp.float32) * (1.0 / (C ** 0.5))
    w2 = jax.random.uniform(k2, (C, H), minval=-1.0, maxval=1.0,
                            dtype=jnp.float32) * (1.0 / (H ** 0.5))

    # One-time weight prep, jitted forward (single dispatch per call).
    w1_b, w2t_b = prepare_weights(w1, w2)
    fwd = jax.jit(mlp_forward)

    out = fwd(x, w1_b, w2t_b)
    out = jax.block_until_ready(out)
    assert out.shape == (B, C)
    assert out.dtype == jnp.bfloat16

    out_f32 = out.astype(jnp.float32)

    # Tight check vs a reference with identical precision choices (only the
    # final bf16 output rounding differs).
    ref_bf16 = reference_mlp_bf16(x, w1, w2)
    assert jnp.allclose(out_f32, ref_bf16, atol=1e-2, rtol=1e-2), "mismatch vs bf16 reference"

    # Loose check vs exact f32 PyTorch semantics (bf16 quantization noise only).
    ref_f32 = reference_mlp_f32(x, w1, w2)
    assert jnp.allclose(out_f32, ref_f32, atol=3e-2, rtol=3e-2), "mismatch vs f32 reference"

    print("KERNEL_OK")
</pallas_src>

<mosaic_0001>
module attributes {stable_mosaic.version = 11 : i64} {
  func.func @_mlp_kernel(%arg0: i32, %arg1: memref<256x128xf32, #tpu.memory_space<vmem>>, %arg2: memref<8x128xbf16, #tpu.memory_space<vmem>>, %arg3: memref<8x128xbf16, #tpu.memory_space<vmem>>, %arg4: memref<256x128xbf16, #tpu.memory_space<vmem>>) attributes {dimension_semantics = [#tpu.dimension_semantics<parallel>], iteration_bounds = array<i64: 2>, scalar_prefetch = 0 : i64, scratch_operands = 0 : i64, tpu.core_type = #tpu.core_type<tc>, window_params = [{transform_indices = @transform_0, window_bounds = array<i64: 256, 128>}, {pipeline_mode = #tpu.pipeline_mode<synchronous>, transform_indices = @transform_1, window_bounds = array<i64: 8, 128>}, {pipeline_mode = #tpu.pipeline_mode<synchronous>, transform_indices = @transform_2, window_bounds = array<i64: 8, 128>}, {transform_indices = @transform_3, window_bounds = array<i64: 256, 128>}]} {
    %c0 = arith.constant 0 : index
    %c0_0 = arith.constant 0 : index
    %0 = vector.load %arg1[%c0, %c0_0] : memref<256x128xf32, #tpu.memory_space<vmem>>, vector<256x128xf32>
    %1 = arith.truncf %0 : vector<256x128xf32> to vector<256x128xbf16>
    %c0_1 = arith.constant 0 : index
    %c0_2 = arith.constant 0 : index
    %2 = vector.load %arg2[%c0_1, %c0_2] : memref<8x128xbf16, #tpu.memory_space<vmem>>, vector<8x128xbf16>
    %c0_3 = arith.constant 0 : index
    %c0_4 = arith.constant 0 : index
    %3 = vector.load %arg3[%c0_3, %c0_4] : memref<8x128xbf16, #tpu.memory_space<vmem>>, vector<8x128xbf16>
    %cst = arith.constant dense<0.000000e+00> : vector<256x8xf32>
    %4 = tpu.matmul %1, %2, %cst {dimension_numbers = #tpu.dot_dimension_numbers<[1], [1], [0], [0], [0, 0, 1, 0], [], []>} : vector<256x128xbf16>, vector<8x128xbf16>, vector<256x8xf32> -> vector<256x8xf32>
    %cst_5 = arith.constant 0.000000e+00 : f32
    %5 = vector.broadcast %cst_5 : f32 to vector<256x8xf32>
    %6 = arith.maximumf %4, %5 : vector<256x8xf32>
    %7 = arith.truncf %6 : vector<256x8xf32> to vector<256x8xbf16>
    %cst_6 = arith.constant dense<0.000000e+00> : vector<256x128xf32>
    %8 = tpu.matmul %7, %3, %cst_6 {dimension_numbers = #tpu.dot_dimension_numbers<[1], [0], [0], [1], [0, 0, 1, 1], [], []>} : vector<256x8xbf16>, vector<8x128xbf16>, vector<256x128xf32> -> vector<256x128xf32>
    %9 = arith.negf %8 : vector<256x128xf32>
    %10 = math.exp %9 : vector<256x128xf32>
    %cst_7 = arith.constant 1.000000e+00 : f32
    %11 = vector.broadcast %cst_7 : f32 to vector<256x128xf32>
    %12 = arith.addf %11, %10 : vector<256x128xf32>
    %13 = arith.divf %11, %12 : vector<256x128xf32>
    %14 = arith.truncf %13 : vector<256x128xf32> to vector<256x128xbf16>
    %c0_8 = arith.constant 0 : index
    %c0_9 = arith.constant 0 : index
    %15 = vector.load %arg4[%c0_8, %c0_9] : memref<256x128xbf16, #tpu.memory_space<vmem>>, vector<256x128xbf16>
    tpu.vector_store %arg4[%c0_8, %c0_9], %14 {strides = array<i32>} : memref<256x128xbf16, #tpu.memory_space<vmem>>, vector<256x128xbf16>,
    return
  }
  func.func @transform_0(%arg0: i32) -> (i32, i32) {
    %c0_i32 = arith.constant 0 : i32
    %c0_i32_0 = arith.constant 0 : i32
    return %arg0, %c0_i32 : i32, i32
  }
  func.func @transform_1(%arg0: i32) -> (i32, i32) {
    %c0_i32 = arith.constant 0 : i32
    %c0_i32_0 = arith.constant 0 : i32
    %c0_i32_1 = arith.constant 0 : i32
    return %c0_i32, %c0_i32_0 : i32, i32
  }
  func.func @transform_2(%arg0: i32) -> (i32, i32) {
    %c0_i32 = arith.constant 0 : i32
    %c0_i32_0 = arith.constant 0 : i32
    %c0_i32_1 = arith.constant 0 : i32
    return %c0_i32, %c0_i32_0 : i32, i32
  }
  func.func @transform_3(%arg0: i32) -> (i32, i32) {
    %c0_i32 = arith.constant 0 : i32
    %c0_i32_0 = arith.constant 0 : i32
    return %arg0, %c0_i32 : i32, i32
  }
}

</mosaic_0001>

<bundles_post_ra>
// kernel: mlp_forward.1
= control target key start
LH: loop header
LB: loop body
LE: loop exit
PB: predicated region body
PF: predicated region fallthrough
CT: control target
= control target key end

     0   :  { %8 = vsyncpa [#allocation3], 0  ;;  %s2649_s0 = inlined_call_operand.hbm [shape: f32[512,128], index: 0, kind: input, shape index: {}]   ;;  %s2650_s1 = inlined_call_operand.hbm [shape: bf16[8,128], index: 1, kind: input, shape index: {}]   ;;  %s2651_s2 = inlined_call_operand.hbm [shape: bf16[8,128], index: 2, kind: input, shape index: {}]   ;;  %s2652_s3 = inlined_call_operand.hbm [shape: bf16[512,128], index: 3, kind: output, shape index: {}]  }
   0x1   :  { %10 = vsyncpa [#allocation3 + $0x1], 0 }
   0x2   :  { %11 = vsyncpa [#allocation6], 0 }
   0x3   :  { %12 = vsyncpa [#allocation4], 0 }
   0x4   :  { %14 = vsyncpa [#allocation4 + $0x1], 0  ;;  %s1884_s12 = smov 0   ;;  %s1886_s13 = smov 0  }
   0x5   :  { %s1888_s14 = smov 0   ;;  %s1890_s15 = smov 0  }
   0x6 LB: > { %s1905_s16 = sadd.s32 4294967295, %s1856_s15   ;;  %s1332_s17 = sadd.s32 4294967294, %s1856_s15   ;;  %s1856_s15 = sphi %s1890_s15, %s2725_s15   ;;  %s1852_s14 = sphi %s1888_s14, %s2724_s14   ;;  %s1848_s13 = sphi %s1886_s13, %s2723_s13   ;;  %s1844_s12 = sphi %s1884_s12, %s2722_s12  }
   0x7   : > { %s1909_s18 = sadd.s32 1, %s1856_s15   ;;  %s27_s19 = sadd.s32 1, %s1852_s14 }
   0x8   : > { %s24_s20 = ssub.s32 %s1856_s15, %s1909_s18  ;;  %p34_p0 = scmp.ne.s32.totalorder %s1852_s14, %s1848_s13 }
   0x9   : > { %p25_p1 = scmp.eq.s32.totalorder %s24_s20, 0  ;;  %p35_p2 = scmp.eq.s32.totalorder %s1856_s15, 0 }
   0xa   : > { %p40_p3 = scmp.ne.s32.totalorder %s1848_s13, %s1844_s12  ;;  %p41_p4 = scmp.eq.s32.totalorder %s1905_s16, 0 }
   0xb   : > { %s1921_s21 = scalar_select %p25_p1, %s1852_s14, %s27_s19  }
   0xc   : > { %p1923_p5 = por %p35_p2, %p34_p0  ;;  %p1929_p6 = por %p41_p4, %p40_p3 }
   0xd   : > { %p106_p7 = scmp.eq.s32.totalorder %s1905_s16, 1  ;;  %p112_p8 = scmp.eq.s32.totalorder %s1332_s17, 1 }
   0xe   : > { %p1333_p9 = scmp.ge.s32.totalorder %s1856_s15, 1  ;;  %p119_p10 = scmp.lt.s32.totalorder %s1856_s15, 3 }
   0xf   : > { %p1936_p11 = por %p106_p7, %p34_p0  ;;  %p1940_p12 = por %p112_p8, %p40_p3 }
  0x10   : > { %p1944_p13 = pnand %p1333_p9, %p119_p10  ;;  %s131_s29 = sshll.u32 %s2650_s1, 4  ;;  %s132_s29 = int_to_ptr.hbm [resolvable:$true] %s131_s29 }
  0x11   : > { %s1858_s30 = smov [#allocation5]   ;;  %p1526_p3 = scmp.lt.s32.totalorder %s1856_s15, 2 }
  0x12   : > { %p1509_p1 = pneg %p1944_p13  ;;  %s133_s4 = sshll.u32 %s1858_s30, 4  ;;  %s134_s4 = int_to_ptr.vmem [resolvable:$true] %s133_s4 }
  0x13   : > { %s143_s7 = sshll.u32 %s2651_s2, 4  ;;  %p1962_p7 = pnand %p1526_p3, %p1923_p5  ;;  %s144_s7 = int_to_ptr.hbm [resolvable:$true] %s143_s7 }
  0x14   : > { %p1510_p2 = pnand %p1509_p1, %p41_p4  ;;  %s1859_s9 = smov [#allocation7]  }
  0x15   : > { %s145_s10 = sshll.u32 %s1859_s9, 4  ;;  %s156_s11 = sand.u32 1, %s1852_s14   ;;  %s146_s10 = int_to_ptr.vmem [resolvable:$true] %s145_s10 }
  0x16   : > { %1512 = dma.hbm_to_vmem [thread:$0]  (!%p1510_p2), %s132_s29, 64, %s134_s4, [#allocation6]  }
  0x17   : > { %1515 = dma.hbm_to_vmem [thread:$0]  (!%p1510_p2), %s144_s7, 64, %s146_s10, [#allocation6]  }
  0x18   : > { %s1337_s17 = sshll.u32 %s156_s11, 8  ;;  %s1398_s19 = sshll.u32 %s1856_s15, 8 }
  0x19   : > { %s165_s28 = scalar_lea.hbm %s2649_s0, %s1398_s19  ;;  %s160_s30 = scalar_lea.vmem [#allocation2], %s1337_s17 }
  0x1a   : > { %s168_s5 = sshll.u32 %s160_s30, 4  ;;  %s166_s29 = sshll.u32 %s165_s28, 4  ;;  %s169_s5 = int_to_ptr.vmem [resolvable:$true] %s168_s5  ;;  %s167_s29 = int_to_ptr.hbm [resolvable:$true] %s166_s29 }
  0x1b   : > { %s157_s22 = scalar_lea.sflag [#allocation3], %s156_s11  ;;  %s1756_s4 = sshra.s32 %s167_s29, 4  ;;  %s1757_s4 = int_to_ptr.hbm [resolvable:$true] %s1756_s4 }
  0x1c   : > { %s1758_s6 = scalar_lea.hbm %s1757_s4, 256  ;;  %p1760_p8 = pneg %p1962_p7 }
  0x1d   : > { %p1759_p5 = scmp.ne.s32.totalorder %s1757_s4, %s1758_s6  ;;  %s1763_s10 = scalar_lea.hbm %s2649_s0, 512 }
  0x1e   : > { %p1764_p1 = scmp.lt.s32.totalorder %s1757_s4, %s2649_s0  ;;  %p1765_p2 = scmp.lt.s32.totalorder %s1763_s10, %s1758_s6 }
  0x1f   : > { %p1761_p9 = pnand %p1760_p8, %p1759_p5 }
  0x20   : > { %p1766_p3 = por %p1765_p2, %p1764_p1 }
  0x21   : > { %p1762_p10 = pneg %p1761_p9 }
  0x23   : > { %p1767_p0 = pnand %p1766_p3, %p1762_p10 }
  0x25   : > { %1770 = shalt.err (!%p1767_p0)
}
  0x26   : > { %s1860_s11 = smov 128   ;;  %s1861_s17 = smov 8  }
  0x27   : > { %1519 = dma.hbm_to_vmem [thread:$0]  (!%p1962_p7), %s167_s29, 4096, %s169_s5, %s157_s22, %s1860_s11, %s1860_s11, %s1861_s17  }
  0x28   : > { %180 = sbr.rel (%p1944_p13) target bundleno = 490 (0x1ea), region = 32  ;;  %s1984_s27 = sand.u32 (!%p1944_p13), 1, %s1848_s13  }
  0x29   : > { %s1341_s28 = sshll.u32 (!%p1944_p13), %s1984_s27, 8  ;;  %s183_s30 = scalar_lea.sflag (!%p1944_p13), [#allocation3], %s1984_s27 }
  0x2a   : > { %s1988_s4 = scalar_lea.vmem (!%p1944_p13), [#allocation2], %s1341_s28 }
  0x2d   : > { %1831 = dma.done.wait (%p1929_p6), %s183_s30, 4096  }
  0x2e   : > { %1833 = vsyncadd (%p1929_p6), %s183_s30, 4294963200 }
  0x2f   : > { %1835 = dma.done.wait (%p41_p4), [#allocation6], 128  }
  0x30   : > { %1837 = vsyncadd (%p41_p4), [#allocation6], 4294967168  ;;  %v271_v0 = vld [vmem:[#allocation5] sm:$0xf]  ;;  %v224_v2 = vld [vmem:[%s1988_s4 + $0x8] sm:$0xff]  ;;  %vm459_vm0 = vcmask 1043456  }
  0x31   : > { %v223_v1 = vld [vmem:[%s1988_s4] sm:$0xff]  ;;  %280 = vmatpush.bf16.xpose.msra.mxu0 %v271_v0  ;;  %1495 = vmatpush.bf16.xpose.msra.mxu2 %v271_v0  ;;  %v240_v4 = vld [vmem:[%s1988_s4 + $0x88] sm:$0xff]  ;;  %v225_v7 = vld [vmem:[%s1988_s4 + $0x10] sm:$0xff]  ;;  %vm410_vm1 = vcmask 64512   ;;  %s1344_s23 = sshll.u32 %s1984_s27, 7  ;;  %s1399_s8 = sshll.u32 %s1905_s16, 7 }
  0x32   : > { %v239_v3 = vld [vmem:[%s1988_s4 + $0x80] sm:$0xff]  ;;  %v255_v5 = vpack.c.bf16 %v224_v2, %v223_v1  ;;  %v226_v8 = vld [vmem:[%s1988_s4 + $0x18] sm:$0xff]  ;;  %v241_v9 = vld [vmem:[%s1988_s4 + $0x90] sm:$0xff]  ;;  %s2065_s26 = scalar_lea.vmem [#allocation8], %s1344_s23  ;;  %s2584_s29 = scalar_lea.hbm %s2652_s3, %s1399_s8 }
  0x33   : > { %v263_v6 = vpack.c.bf16 %v240_v4, %v239_v3  ;;  %v242_v10 = vld [vmem:[%s1988_s4 + $0x98] sm:$0xff]  ;;  %v256_v11 = vpack.c.bf16 %v226_v8, %v225_v7  ;;  %v227_v13 = vld [vmem:[%s1988_s4 + $0x20] sm:$0xff]  ;;  %v228_v14 = vld [vmem:[%s1988_s4 + $0x28] sm:$0xff]  ;;  %s1237_s22 = sshll.u32 %s2065_s26, 4  ;;  %s1239_s6 = sshll.u32 %s2584_s29, 4  ;;  %s1238_s22 = int_to_ptr.vmem [resolvable:$true] %s1237_s22  ;;  %s1240_s6 = int_to_ptr.hbm [resolvable:$true] %s1239_s6 }
  0x34   : > { %v264_v12 = vpack.c.bf16 %v242_v10, %v241_v9  ;;  %v243_v15 = vld [vmem:[%s1988_s4 + $0xa0] sm:$0xff]  ;;  %v244_v16 = vld [vmem:[%s1988_s4 + $0xa8] sm:$0xff]  ;;  %v257_v17 = vpack.c.bf16 %v228_v14, %v227_v13  ;;  %v229_v19 = vld [vmem:[%s1988_s4 + $0x30] sm:$0xff]  ;;  %s1225_s7 = scalar_lea.sflag [#allocation4], %s1984_s27  ;;  %s1800_s9 = sshra.s32 %s1240_s6, 4  ;;  %s1801_s9 = int_to_ptr.hbm [resolvable:$true] %s1800_s9 }
  0x35   : > { %v265_v18 = vpack.c.bf16 %v244_v16, %v243_v15  ;;  %v230_v20 = vld [vmem:[%s1988_s4 + $0x38] sm:$0xff]  ;;  %v245_v21 = vld [vmem:[%s1988_s4 + $0xb0] sm:$0xff]  ;;  %v231_v25 = vld [vmem:[%s1988_s4 + $0x40] sm:$0xff]  ;;  %s1802_s10 = scalar_lea.hbm %s1801_s9, 128  ;;  %s1806_s11 = scalar_lea.hbm %s2652_s3, 256 }
  0x36   : > { %v246_v22 = vld [vmem:[%s1988_s4 + $0xb8] sm:$0xff]  ;;  %v258_v23 = vpack.c.bf16 %v230_v20, %v229_v19  ;;  %v232_v26 = vld [vmem:[%s1988_s4 + $0x48] sm:$0xff]  ;;  %v247_v27 = vld [vmem:[%s1988_s4 + $0xc0] sm:$0xff]  ;;  %p1803_p4 = scmp.ne.s32.totalorder %s1801_s9, %s1802_s10  ;;  %p1807_p0 = scmp.lt.s32.totalorder %s1801_s9, %s2652_s3 }
  0x37   : > { %v266_v24 = vpack.c.bf16 %v246_v22, %v245_v21  ;;  %v248_v28 = vld [vmem:[%s1988_s4 + $0xc8] sm:$0xff]  ;;  %v259_v29 = vpack.c.bf16 %v232_v26, %v231_v25  ;;  %v233_v31 = vld [vmem:[%s1988_s4 + $0x50] sm:$0xff]  ;;  %v234_v32 = vld [vmem:[%s1988_s4 + $0x58] sm:$0xff]  ;;  %p1808_p7 = scmp.lt.s32.totalorder %s1806_s11, %s1802_s10 }
  0x38   : > { %281 = vmatmul.bf16.vlgmr.msra.gmra.mxu0 %v255_v5  ;;  %321 = vmatmul.bf16.vlgmr.msra.gmra.mxu2 %v263_v6  ;;  %v267_v30 = vpack.c.bf16 %v248_v28, %v247_v27  ;;  %v249_v33 = vld [vmem:[%s1988_s4 + $0xd0] sm:$0xff]  ;;  %v250_v34 = vld [vmem:[%s1988_s4 + $0xd8] sm:$0xff]  ;;  %v260_v35 = vpack.c.bf16 %v234_v32, %v233_v31  ;;  %v235_v37 = vld [vmem:[%s1988_s4 + $0x60] sm:$0xff]  ;;  %p1804_p6 = pnand %p1803_p4, %p1936_p11 }
  0x39   : > { %v268_v36 = vpack.c.bf16 %v250_v34, %v249_v33  ;;  %v236_v38 = vld [vmem:[%s1988_s4 + $0x68] sm:$0xff]  ;;  %v251_v39 = vld [vmem:[%s1988_s4 + $0xe0] sm:$0xff]  ;;  %v237_v45 = vld [vmem:[%s1988_s4 + $0x70] sm:$0xff]  ;;  %p1809_p5 = por %p1808_p7, %p1807_p0 }
  0x3a   : > { %v252_v40 = vld [vmem:[%s1988_s4 + $0xe8] sm:$0xff]  ;;  %v261_v41 = vpack.c.bf16 %v236_v38, %v235_v37  ;;  %v272_v43 = vld [vmem:[#allocation7] sm:$0xf]  ;;  %v238_v46 = vld [vmem:[%s1988_s4 + $0x78] sm:$0xff]  ;;  %p1805_p13 = pneg %p1804_p6 }
  0x3b   : > { %v269_v42 = vpack.c.bf16 %v252_v40, %v251_v39  ;;  %v461_v44 = vsel %vm459_vm0, %v272_v43, 0  ;;  %v253_v47 = vld [vmem:[%s1988_s4 + $0xf0] sm:$0xff]  ;;  %v254_v48 = vld [vmem:[%s1988_s4 + $0xf8] sm:$0xff]  ;;  %v262_v49 = vpack.c.bf16 %v238_v46, %v237_v45 }
  0x3c   : > { %470 = vmatpush.bf16.msra.mxu1 %v461_v44  ;;  %1496 = vmatpush.bf16.msra.mxu3 %v461_v44  ;;  %v270_v50 = vpack.c.bf16 %v254_v48, %v253_v47  ;;  %p1810_p8 = pnand %p1809_p5, %p1805_p13 }
  0x48   : > { %286 = vmatmul.bf16.gmra.mxu0 %v256_v11  ;;  %326 = vmatmul.bf16.gmra.mxu2 %v264_v12 }
  0x58   : > { %291 = vmatmul.bf16.gmra.mxu0 %v257_v17  ;;  %331 = vmatmul.bf16.gmra.mxu2 %v265_v18 }
  0x68   : > { %296 = vmatmul.bf16.gmra.mxu0 %v258_v23  ;;  %336 = vmatmul.bf16.gmra.mxu2 %v266_v24 }
  0x78   : > { %301 = vmatmul.bf16.gmra.mxu0 %v259_v29  ;;  %341 = vmatmul.bf16.gmra.mxu2 %v267_v30 }
  0x88   : > { %306 = vmatmul.bf16.gmra.mxu0 %v260_v35  ;;  %346 = vmatmul.bf16.gmra.mxu2 %v268_v36 }
  0x98   : > { %311 = vmatmul.bf16.gmra.mxu0 %v261_v41  ;;  %351 = vmatmul.bf16.gmra.mxu2 %v269_v42 }
  0xa8   : > { %316 = vmatmul.bf16.gmra.mxu0 %v262_v49  ;;  %356 = vmatmul.bf16.gmra.mxu2 %v270_v50 }
  0xb5   : > { %v282_v51 = vpop.f32.mrf.mxu0 }
  0xb6   : > { %v362_v54 = vmax.f32 %v282_v51, 0.0 }
  0xbb   : > { %v322_v52 = vpop.f32.mrf.mxu2 }
  0xbc   : > { %v378_v58 = vmax.f32 %v322_v52, 0.0 }
  0xbd   : > { %v284_v53 = vpop.f32.mrf.mxu0 }
  0xbe   : > { %v363_v55 = vmax.f32 %v284_v53, 0.0 }
  0xc0   : > { %v394_v56 = vpack.c.bf16 %v363_v55, %v362_v54 }
  0xc2   : > { %1345 = vmatmul.msk.bf16.vlgmr.msra.gmra.mxu1 %vm410_vm1, %v394_v56 }
  0xc3   : > { %v324_v57 = vpop.f32.mrf.mxu2 }
  0xc4   : > { %v379_v59 = vmax.f32 %v324_v57, 0.0 }
  0xc5   : > { %v287_v60 = vpop.f32.mrf.mxu0 }
  0xc6   : > { %v2031_v61 = vpack.c.bf16 %v379_v59, %v378_v58  ;;  %v364_v0 = vmax.f32 %v287_v60, 0.0 }
  0xcb   : > { %v327_v62 = vpop.f32.mrf.mxu2 }
  0xcc   : > { %v380_v4 = vmax.f32 %v327_v62, 0.0 }
  0xcd   : > { %v289_v63 = vpop.f32.mrf.mxu0 }
  0xce   : > { %v365_v1 = vmax.f32 %v289_v63, 0.0 }
  0xd0   : > { %v395_v2 = vpack.c.bf16 %v365_v1, %v364_v0 }
  0xd2   : > { %1346 = vmatmul.msk.bf16.gmra.mxu1 %vm410_vm1, %v395_v2 }
  0xd3   : > { %v329_v3 = vpop.f32.mrf.mxu2 }
  0xd4   : > { %v381_v5 = vmax.f32 %v329_v3, 0.0 }
  0xd5   : > { %v292_v6 = vpop.f32.mrf.mxu0 }
  0xd6   : > { %v403_v7 = vpack.c.bf16 %v381_v5, %v380_v4  ;;  %v366_v10 = vmax.f32 %v292_v6, 0.0 }
  0xd8   : > { %1354 = vmatmul.msk.bf16.vlgmr.msra.gmra.mxu3 %vm410_vm1, %v403_v7 }
  0xdb   : > { %v332_v8 = vpop.f32.mrf.mxu2 }
  0xdc   : > { %v382_v14 = vmax.f32 %v332_v8, 0.0 }
  0xdd   : > { %v294_v9 = vpop.f32.mrf.mxu0 }
  0xde   : > { %v367_v11 = vmax.f32 %v294_v9, 0.0 }
  0xe0   : > { %v396_v12 = vpack.c.bf16 %v367_v11, %v366_v10 }
  0xe2   : > { %1347 = vmatmul.msk.bf16.gmra.mxu1 %vm410_vm1, %v396_v12 }
  0xe3   : > { %v334_v13 = vpop.f32.mrf.mxu2 }
  0xe4   : > { %v383_v15 = vmax.f32 %v334_v13, 0.0 }
  0xe5   : > { %v297_v16 = vpop.f32.mrf.mxu0 }
  0xe6   : > { %v404_v17 = vpack.c.bf16 %v383_v15, %v382_v14  ;;  %v368_v20 = vmax.f32 %v297_v16, 0.0 }
  0xe8   : > { %1355 = vmatmul.msk.bf16.gmra.mxu3 %vm410_vm1, %v404_v17 }
  0xeb   : > { %v337_v18 = vpop.f32.mrf.mxu2 }
  0xec   : > { %v384_v24 = vmax.f32 %v337_v18, 0.0 }
  0xed   : > { %v299_v19 = vpop.f32.mrf.mxu0 }
  0xee   : > { %v369_v21 = vmax.f32 %v299_v19, 0.0 }
  0xf0   : > { %v397_v22 = vpack.c.bf16 %v369_v21, %v368_v20 }
  0xf2   : > { %1348 = vmatmul.msk.bf16.gmra.mxu1 %vm410_vm1, %v397_v22 }
  0xf3   : > { %v339_v23 = vpop.f32.mrf.mxu2 }
  0xf4   : > { %v385_v25 = vmax.f32 %v339_v23, 0.0 }
  0xf5   : > { %v302_v26 = vpop.f32.mrf.mxu0 }
  0xf6   : > { %v405_v27 = vpack.c.bf16 %v385_v25, %v384_v24  ;;  %v370_v30 = vmax.f32 %v302_v26, 0.0 }
  0xf8   : > { %1356 = vmatmul.msk.bf16.gmra.mxu3 %vm410_vm1, %v405_v27 }
  0xfb   : > { %v342_v28 = vpop.f32.mrf.mxu2 }
  0xfc   : > { %v386_v34 = vmax.f32 %v342_v28, 0.0 }
  0xfd   : > { %v304_v29 = vpop.f32.mrf.mxu0 }
  0xfe   : > { %v371_v31 = vmax.f32 %v304_v29, 0.0 }
 0x100   : > { %v398_v32 = vpack.c.bf16 %v371_v31, %v370_v30 }
 0x102   : > { %1349 = vmatmul.msk.bf16.gmra.mxu1 %vm410_vm1, %v398_v32 }
 0x103   : > { %v344_v33 = vpop.f32.mrf.mxu2 }
 0x104   : > { %v387_v35 = vmax.f32 %v344_v33, 0.0 }
 0x105   : > { %v307_v36 = vpop.f32.mrf.mxu0 }
 0x106   : > { %v406_v37 = vpack.c.bf16 %v387_v35, %v386_v34  ;;  %v372_v40 = vmax.f32 %v307_v36, 0.0 }
 0x108   : > { %1357 = vmatmul.msk.bf16.gmra.mxu3 %vm410_vm1, %v406_v37 }
 0x10b   : > { %v347_v38 = vpop.f32.mrf.mxu2 }
 0x10c   : > { %v388_v44 = vmax.f32 %v347_v38, 0.0 }
 0x10d   : > { %v309_v39 = vpop.f32.mrf.mxu0 }
 0x10e   : > { %v373_v41 = vmax.f32 %v309_v39, 0.0 }
 0x110   : > { %v399_v42 = vpack.c.bf16 %v373_v41, %v372_v40 }
 0x112   : > { %1350 = vmatmul.msk.bf16.gmra.mxu1 %vm410_vm1, %v399_v42 }
 0x113   : > { %v349_v43 = vpop.f32.mrf.mxu2 }
 0x114   : > { %v389_v45 = vmax.f32 %v349_v43, 0.0 }
 0x115   : > { %v312_v46 = vpop.f32.mrf.mxu0 }
 0x116   : > { %v407_v47 = vpack.c.bf16 %v389_v45, %v388_v44  ;;  %v374_v50 = vmax.f32 %v312_v46, 0.0 }
 0x118   : > { %1358 = vmatmul.msk.bf16.gmra.mxu3 %vm410_vm1, %v407_v47 }
 0x11b   : > { %v352_v48 = vpop.f32.mrf.mxu2 }
 0x11c   : > { %v390_v54 = vmax.f32 %v352_v48, 0.0 }
 0x11d   : > { %v314_v49 = vpop.f32.mrf.mxu0 }
 0x11e   : > { %v375_v51 = vmax.f32 %v314_v49, 0.0 }
 0x120   : > { %v400_v52 = vpack.c.bf16 %v375_v51, %v374_v50 }
 0x122   : > { %1351 = vmatmul.msk.bf16.gmra.mxu1 %vm410_vm1, %v400_v52 }
 0x123   : > { %v354_v53 = vpop.f32.mrf.mxu2 }
 0x124   : > { %v391_v55 = vmax.f32 %v354_v53, 0.0 }
 0x125   : > { %v317_v56 = vpop.f32.mrf.mxu0 }
 0x126   : > { %v408_v57 = vpack.c.bf16 %v391_v55, %v390_v54  ;;  %v376_v60 = vmax.f32 %v317_v56, 0.0 }
 0x128   : > { %1359 = vmatmul.msk.bf16.gmra.mxu3 %vm410_vm1, %v408_v57 }
 0x12b   : > { %v357_v58 = vpop.f32.mrf.mxu2 }
 0x12c   : > { %v392_v1 = vmax.f32 %v357_v58, 0.0 }
 0x12d   : > { %v319_v59 = vpop.f32.mrf.mxu0 }
 0x12e   : > { %v377_v62 = vmax.f32 %v319_v59, 0.0 }
 0x130   : > { %v401_v63 = vpack.c.bf16 %v377_v62, %v376_v60 }
 0x132   : > { %1352 = vmatmul.msk.bf16.gmra.mxu1 %vm410_vm1, %v401_v63 }
 0x133   : > { %v359_v0 = vpop.f32.mrf.mxu2 }
 0x134   : > { %v393_v2 = vmax.f32 %v359_v0, 0.0 }
 0x136   : > { %v409_v3 = vpack.c.bf16 %v393_v2, %v392_v1 }
 0x138   : > { %1360 = vmatmul.msk.bf16.gmra.mxu3 %vm410_vm1, %v409_v3 }
 0x13f   : > { %v472_v4 = vpop.f32.mrf.mxu1 }
 0x140   : > { %v1361_v5 = vmul.f32 -1.442695, %v472_v4 }
 0x142   : > { %1568 = vpow2.f32 %v1361_v5  ;;  %1353 = vmatmul.msk.bf16.gmra.mxu1 %vm410_vm1, %v2031_v61 }
 0x147   : > { %v474_v6 = vpop.f32.mrf.mxu1 }
 0x148   : > { %v1569_v7 = vpop.eup %1568  ;;  %v1362_v8 = vmul.f32 -1.442695, %v474_v6 }
 0x149   : > { %v648_v9 = vadd.f32 1.0, %v1569_v7 }
 0x14a   : > { %1570 = vpow2.f32 %v1362_v8 }
 0x14b   : > { %1572 = vrcp.f32 %v648_v9  ;;  %vm685_vm3 = vweird.f32 %v648_v9  ;;  %v689_v27 = vand.u32 2147483647, %v648_v9  ;;  %v691_v28 = vand.u32 2147483648, %v648_v9 }
 0x14d   : > { %vm690_vm7 = vcmp.eq.f32.partialorder %v689_v27, 8.507059e+37  ;;  %v692_v39 = vor.u32 1.1754944e-38, %v691_v28 }
 0x14f   : > { %v477_v10 = vpop.f32.mrf.mxu1 }
 0x150   : > { %v1571_v11 = vpop.eup %1570  ;;  %v1363_v12 = vmul.f32 -1.442695, %v477_v10 }
 0x151   : > { %v1573_v13 = vpop.eup %1572  ;;  %v649_v14 = vadd.f32 1.0, %v1571_v11 }
 0x152   : > { %v681_v15 = vmul.f32 %v1573_v13, %v648_v9  ;;  %1574 = vpow2.f32 %v1363_v12  ;;  %vm686_vm2 = vweird.f32 %v1573_v13 }
 0x153   : > { %1576 = vrcp.f32 %v649_v14  ;;  %v706_v29 = vand.u32 2147483648, %v649_v14  ;;  %v704_v31 = vand.u32 2147483647, %v649_v14  ;;  %vm2052_vm5 = vmor %vm685_vm3, %vm686_vm2  ;;  %vm700_vm6 = vweird.f32 %v649_v14 }
 0x154   : > { %v682_v16 = vsub.f32 1.0, %v681_v15 }
 0x155   : > { %v707_v40 = vor.u32 1.1754944e-38, %v706_v29  ;;  %vm705_vm9 = vcmp.eq.f32.partialorder %v704_v31, 8.507059e+37 }
 0x156   : > { %v683_v19 = vmul.f32 %v1573_v13, %v682_v16 }
 0x157   : > { %v479_v17 = vpop.f32.mrf.mxu1 }
 0x158   : > { %v1575_v18 = vpop.eup %1574  ;;  %v1364_v20 = vmul.f32 -1.442695, %v479_v17  ;;  %v684_v24 = vadd.f32 %v1573_v13, %v683_v19 }
 0x159   : > { %v1577_v61 = vpop.eup %1576  ;;  %v2049_v21 = vadd.f32 1.0, %v1575_v18 }
 0x15a   : > { %v696_v22 = vmul.f32 %v1577_v61, %v649_v14  ;;  %1578 = vpow2.f32 %v1364_v20  ;;  %vm701_vm4 = vweird.f32 %v1577_v61  ;;  %v688_v35 = vsel %vm2052_vm5, %v1573_v13, %v684_v24 }
 0x15b   : > { %1580 = vrcp.f32 %v2049_v21  ;;  %v517_v23 = vpop.f32.mrf.mxu3  ;;  %vm702_vm8 = vmor %vm700_vm6, %vm701_vm4  ;;  %v693_v44 = vsel %vm690_vm7, %v692_v39, %v688_v35  ;;  %v719_v59 = vand.u32 2147483647, %v2049_v21  ;;  %v721_v60 = vand.u32 2147483648, %v2049_v21 }
 0x15c   : > { %v697_v25 = vsub.f32 1.0, %v696_v22  ;;  %v1379_v26 = vmul.f32 -1.442695, %v517_v23  ;;  %vm715_vm11 = vweird.f32 %v2049_v21 }
 0x15d   : > { %vm2088_vm14 = vcmp.eq.f32.partialorder %v719_v59, 8.507059e+37  ;;  %v722_v11 = vor.u32 1.1754944e-38, %v721_v60 }
 0x15e   : > { %v698_v30 = vmul.f32 %v1577_v61, %v697_v25  ;;  %1582 = vpow2.f32 %v1379_v26 }
 0x15f   : > { %v482_v33 = vpop.f32.mrf.mxu1 }
 0x160   : > { %v1579_v34 = vpop.eup %1578  ;;  %v699_v36 = vadd.f32 %v1577_v61, %v698_v30  ;;  %v1365_v37 = vmul.f32 -1.442695, %v482_v33 }
 0x161   : > { %v2059_v38 = vpop.eup %1580  ;;  %v651_v41 = vadd.f32 1.0, %v1579_v34 }
 0x162   : > { %v703_v42 = vsel %vm702_vm8, %v1577_v61, %v699_v36  ;;  %v711_v43 = vmul.f32 %v2059_v38, %v2049_v21  ;;  %1584 = vpow2.f32 %v1365_v37  ;;  %vm716_vm10 = vweird.f32 %v2059_v38 }
 0x163   : > { %v708_v45 = vsel %vm705_vm9, %v707_v40, %v703_v42  ;;  %1586 = vrcp.f32 %v651_v41  ;;  %v519_v46 = vpop.f32.mrf.mxu3  ;;  %v734_v4 = vand.u32 2147483647, %v651_v41  ;;  %v736_v5 = vand.u32 2147483648, %v651_v41  ;;  %vm2084_vm13 = vmor %vm715_vm11, %vm716_vm10 }
 0x164   : > { %v1583_v47 = vpop.eup %1582  ;;  %v1403_v48 = vpack.c.bf16 %v708_v45, %v693_v44  ;;  %v712_v49 = vsub.f32 1.0, %v711_v43  ;;  %v1380_v50 = vmul.f32 -1.442695, %v519_v46  ;;  %vm730_vm15 = vweird.f32 %v651_v41 }
 0x165   : > { %v2063_v51 = vadd.f32 1.0, %v1583_v47  ;;  %vm735_vm1 = vcmp.eq.f32.partialorder %v734_v4, 8.507059e+37  ;;  %v737_v18 = vor.u32 1.1754944e-38, %v736_v5 }
 0x166   : > { %1404 = vst [vmem:[%s2065_s26] sm:$0xff] %v1403_v48   ;;  %1588 = vpow2.f32 %v1380_v50  ;;  %v713_v54 = vmul.f32 %v2059_v38, %v712_v49 }
 0x167   : > { %1590 = vrcp.f32 %v2063_v51  ;;  %v484_v52 = vpop.f32.mrf.mxu1  ;;  %v959_v22 = vand.u32 2147483647, %v2063_v51  ;;  %v961_v26 = vand.u32 2147483648, %v2063_v51  ;;  %vm955_vm2 = vweird.f32 %v2063_v51 }
 0x168   : > { %v1585_v53 = vpop.eup %1584  ;;  %v1366_v55 = vmul.f32 -1.442695, %v484_v52  ;;  %v714_v0 = vadd.f32 %v2059_v38, %v713_v54 }
 0x169   : > { %v1587_v56 = vpop.eup %1586  ;;  %v2070_v57 = vadd.f32 1.0, %v1585_v53  ;;  %vm2113_vm4 = vcmp.eq.f32.partialorder %v959_v22, 8.507059e+37  ;;  %v962_v37 = vor.u32 1.1754944e-38, %v961_v26 }
 0x16a   : > { %v726_v58 = vmul.f32 %v1587_v56, %v651_v41  ;;  %1592 = vpow2.f32 %v1366_v55  ;;  %vm731_vm12 = vweird.f32 %v1587_v56  ;;  %v718_v14 = vsel %vm2084_vm13, %v2059_v38, %v714_v0 }
 0x16b   : > { %1594 = vrcp.f32 %v2070_v57  ;;  %v522_v62 = vpop.f32.mrf.mxu3  ;;  %vm732_vm0 = vmor %vm730_vm15, %vm731_vm12  ;;  %v723_v24 = vsel %vm2088_vm14, %v722_v11, %v718_v14  ;;  %v751_v31 = vand.u32 2147483648, %v2070_v57  ;;  %vm745_vm5 = vweird.f32 %v2070_v57 }
 0x16c   : > { %v1589_v63 = vpop.eup %1588  ;;  %v727_v1 = vsub.f32 1.0, %v726_v58  ;;  %v1381_v2 = vmul.f32 -1.442695, %v522_v62  ;;  %v749_v46 = vand.u32 2147483647, %v2070_v57 }
 0x16d   : > { %v2077_v3 = vpop.eup %1590  ;;  %v2079_v6 = vadd.f32 1.0, %v1589_v63  ;;  %v752_v47 = vor.u32 1.1754944e-38, %v751_v31 }
 0x16e   : > { %v728_v7 = vmul.f32 %v1587_v56, %v727_v1  ;;  %v951_v8 = vmul.f32 %v2077_v3, %v2063_v51  ;;  %vm956_vm3 = vweird.f32 %v2077_v3  ;;  %vm750_vm15 = vcmp.eq.f32.partialorder %v749_v46, 8.507059e+37 }
 0x16f   : > { %1596 = vrcp.f32 %v2079_v6  ;;  %v487_v12 = vpop.f32.mrf.mxu1  ;;  %v974_v42 = vand.u32 2147483647, %v2079_v6  ;;  %vm2125_vm6 = vmor %vm955_vm2, %vm956_vm3  ;;  %v976_v48 = vand.u32 2147483648, %v2079_v6  ;;  %vm970_vm9 = vweird.f32 %v2079_v6 }
 0x170   : > { %v1593_v13 = vpop.eup %1592  ;;  %v729_v15 = vadd.f32 %v1587_v56, %v728_v7  ;;  %v952_v16 = vsub.f32 1.0, %v951_v8  ;;  %1598 = vpow2.f32 %v1381_v2  ;;  %v1367_v20 = vmul.f32 -1.442695, %v487_v12 }
 0x171   : > { %v2096_v17 = vpop.eup %1594  ;;  %v2098_v19 = vadd.f32 1.0, %v1593_v13  ;;  %vm2139_vm10 = vcmp.eq.f32.partialorder %v974_v42, 8.507059e+37  ;;  %v977_v63 = vor.u32 1.1754944e-38, %v976_v48 }
 0x172   : > { %v733_v61 = vsel %vm732_vm0, %v1587_v56, %v729_v15  ;;  %v953_v21 = vmul.f32 %v2077_v3, %v952_v16  ;;  %v741_v23 = vmul.f32 %v2096_v17, %v2070_v57  ;;  %vm746_vm8 = vweird.f32 %v2096_v17 }
 0x173   : > { %v738_v25 = vsel %vm735_vm1, %v737_v18, %v733_v61  ;;  %1600 = vrcp.f32 %v2098_v19  ;;  %v524_v27 = vpop.f32.mrf.mxu3  ;;  %v764_v0 = vand.u32 2147483647, %v2098_v19  ;;  %v766_v1 = vand.u32 2147483648, %v2098_v19  ;;  %vm2151_vm12 = vmor %vm745_vm5, %vm746_vm8 }
 0x174   : > { %v1408_v28 = vpack.c.bf16 %v738_v25, %v723_v24  ;;  %v742_v29 = vsub.f32 1.0, %v741_v23  ;;  %1602 = vpow2.f32 %v1367_v20  ;;  %v1382_v32 = vmul.f32 -1.442695, %v524_v27 }
 0x175   : > { %v1597_v30 = vpop.eup %1596  ;;  %v954_v34 = vadd.f32 %v2077_v3, %v953_v21  ;;  %vm760_vm14 = vweird.f32 %v2098_v19  ;;  %v767_v14 = vor.u32 1.1754944e-38, %v766_v1  ;;  %vm765_vm1 = vcmp.eq.f32.partialorder %v764_v0, 8.507059e+37 }
 0x176   : > { %v1599_v33 = vpop.eup %1598  ;;  %1480 = vst [vmem:[%s2065_s26 + $0x8] sm:$0xff] %v1408_v28   ;;  %v966_v36 = vmul.f32 %v1597_v30, %v2079_v6  ;;  %v743_v38 = vmul.f32 %v2096_v17, %v742_v29  ;;  %1604 = vpow2.f32 %v1382_v32  ;;  %vm971_vm7 = vweird.f32 %v1597_v30 }
 0x177   : > { %v2119_v39 = vadd.f32 1.0, %v1599_v33  ;;  %v489_v40 = vpop.f32.mrf.mxu1  ;;  %v958_v49 = vsel %vm2125_vm6, %v2077_v3, %v954_v34  ;;  %vm972_vm11 = vmor %vm970_vm9, %vm971_vm7 }
 0x178   : > { %v967_v41 = vsub.f32 1.0, %v966_v36  ;;  %v1368_v43 = vmul.f32 -1.442695, %v489_v40  ;;  %v744_v53 = vadd.f32 %v2096_v17, %v743_v38  ;;  %v963_v62 = vsel %vm2113_vm4, %v962_v37, %v958_v49 }
 0x179   : > { %v1601_v44 = vpop.eup %1600  ;;  %1606 = vrcp.f32 %v2119_v39  ;;  %v989_v23 = vand.u32 2147483647, %v2119_v39  ;;  %v991_v24 = vand.u32 2147483648, %v2119_v39  ;;  %vm985_vm2 = vweird.f32 %v2119_v39 }
 0x17a   : > { %v968_v50 = vmul.f32 %v1597_v30, %v967_v41  ;;  %v756_v52 = vmul.f32 %v1601_v44, %v2098_v19  ;;  %v1603_v51 = vpop.eup %1602  ;;  %1608 = vpow2.f32 %v1368_v43  ;;  %vm761_vm13 = vweird.f32 %v1601_v44 }
 0x17b   : > { %v527_v54 = vpop.f32.mrf.mxu3  ;;  %v2143_v59 = vadd.f32 1.0, %v1603_v51  ;;  %v748_v6 = vsel %vm2151_vm12, %v2096_v17, %v744_v53  ;;  %vm762_vm0 = vmor %vm760_vm14, %vm761_vm13  ;;  %vm2183_vm3 = vcmp.eq.f32.partialorder %v989_v23, 8.507059e+37  ;;  %v992_v33 = vor.u32 1.1754944e-38, %v991_v24 }
 0x17c   : > { %v969_v55 = vadd.f32 %v1597_v30, %v968_v50  ;;  %v757_v58 = vsub.f32 1.0, %v756_v52  ;;  %v1605_v60 = vpop.eup %1604  ;;  %v1383_v8 = vmul.f32 -1.442695, %v527_v54  ;;  %v753_v15 = vsel %vm750_vm15, %v752_v47, %v748_v6 }
 0x17d   : > { %1610 = vrcp.f32 %v2143_v59  ;;  %v2163_v57 = vadd.f32 1.0, %v1605_v60  ;;  %vm775_vm4 = vweird.f32 %v2143_v59  ;;  %v779_v37 = vand.u32 2147483647, %v2143_v59 }
 0x17e   : > { %v973_v3 = vsel %vm972_vm11, %v1597_v30, %v969_v55  ;;  %v758_v4 = vmul.f32 %v1601_v44, %v757_v58 }
 0x17f   : > { %v2156_v5 = vpop.eup %1606  ;;  %v978_v7 = vsel %vm2139_vm10, %v977_v63, %v973_v3  ;;  %v492_v9 = vpop.f32.mrf.mxu1  ;;  %1612 = vrcp.f32 %v2163_v57  ;;  %v1004_v29 = vand.u32 2147483647, %v2163_v57  ;;  %v1006_v38 = vand.u32 2147483648, %v2163_v57 }
 0x180   : > { %v1448_v10 = vpack.c.bf16 %v978_v7, %v963_v62  ;;  %v759_v11 = vadd.f32 %v1601_v44, %v758_v4  ;;  %v981_v12 = vmul.f32 %v2156_v5, %v2119_v39  ;;  %v1609_v13 = vpop.eup %1608  ;;  %1614 = vpow2.f32 %v1383_v8 }
 0x181   : > { %v2170_v20 = vadd.f32 1.0, %v1609_v13  ;;  %v1369_v19 = vmul.f32 -1.442695, %v492_v9  ;;  %vm986_vm5 = vweird.f32 %v2156_v5  ;;  %vm1000_vm6 = vweird.f32 %v2163_v57 }
 0x182   : > { %1488 = vst [vmem:[%s2065_s26 + $0x48] sm:$0xff] %v1448_v10   ;;  %v763_v16 = vsel %vm762_vm0, %v1601_v44, %v759_v11  ;;  %v982_v17 = vsub.f32 1.0, %v981_v12  ;;  %v781_v44 = vand.u32 2147483648, %v2143_v59  ;;  %vm2198_vm7 = vcmp.eq.f32.partialorder %v1004_v29, 8.507059e+37  ;;  %vm2206_vm9 = vmor %vm985_vm2, %vm986_vm5 }
 0x183   : > { %v768_v18 = vsel %vm765_vm1, %v767_v14, %v763_v16  ;;  %v529_v61 = vpop.f32.mrf.mxu3  ;;  %v2172_v21 = vpop.eup %1610  ;;  %1616 = vrcp.f32 %v2170_v20  ;;  %v1007_v53 = vor.u32 1.1754944e-38, %v1006_v38  ;;  %vm790_vm11 = vweird.f32 %v2170_v20 }
 0x184   : > { %v1413_v22 = vpack.c.bf16 %v768_v18, %v753_v15  ;;  %v771_v25 = vmul.f32 %v2172_v21, %v2143_v59  ;;  %v983_v26 = vmul.f32 %v2156_v5, %v982_v17  ;;  %1618 = vpow2.f32 %v1369_v19 }
 0x185   : > { %v1613_v27 = vpop.eup %1612  ;;  %v1384_v30 = vmul.f32 -1.442695, %v529_v61  ;;  %vm776_vm10 = vweird.f32 %v2172_v21  ;;  %v794_v60 = vand.u32 2147483647, %v2170_v20  ;;  %v796_v62 = vand.u32 2147483648, %v2170_v20 }
 0x186   : > { %1481 = vst [vmem:[%s2065_s26 + $0x10] sm:$0xff] %v1413_v22   ;;  %v772_v28 = vsub.f32 1.0, %v771_v25  ;;  %v996_v34 = vmul.f32 %v1613_v27, %v2163_v57  ;;  %v1615_v35 = vpop.eup %1614  ;;  %v984_v40 = vadd.f32 %v2156_v5, %v983_v26  ;;  %vm1001_vm8 = vweird.f32 %v1613_v27  ;;  %vm2224_vm13 = vmor %vm775_vm4, %vm776_vm10 }
 0x187   : > { %v494_v31 = vpop.f32.mrf.mxu1  ;;  %1620 = vpow2.f32 %v1384_v30  ;;  %v2194_v42 = vadd.f32 1.0, %v1615_v35  ;;  %vm1002_vm12 = vmor %vm1000_vm6, %vm1001_vm8  ;;  %v782_v10 = vor.u32 1.1754944e-38, %v781_v44  ;;  %v797_v11 = vor.u32 1.1754944e-38, %v796_v62 }
 0x188   : > { %v773_v36 = vmul.f32 %v2172_v21, %v772_v28  ;;  %v997_v41 = vsub.f32 1.0, %v996_v34  ;;  %v1370_v46 = vmul.f32 -1.442695, %v494_v31  ;;  %v988_v54 = vsel %vm2206_vm9, %v2156_v5, %v984_v40 }
 0x189   : > { %v1617_v43 = vpop.eup %1616  ;;  %1622 = vrcp.f32 %v2194_v42  ;;  %v993_v4 = vsel %vm2183_vm3, %v992_v33, %v988_v54  ;;  %vm780_vm0 = vcmp.eq.f32.partialorder %v779_v37, 8.507059e+37  ;;  %vm795_vm1 = vcmp.eq.f32.partialorder %v794_v60, 8.507059e+37 }
 0x18a   : > { %v1619_v48 = vpop.eup %1618  ;;  %v998_v49 = vmul.f32 %v1613_v27, %v997_v41  ;;  %v786_v50 = vmul.f32 %v1617_v43, %v2170_v20  ;;  %v774_v51 = vadd.f32 %v2172_v21, %v773_v36  ;;  %1624 = vpow2.f32 %v1370_v46 }
 0x18b   : > { %v532_v47 = vpop.f32.mrf.mxu3  ;;  %v2216_v58 = vadd.f32 1.0, %v1619_v48  ;;  %vm791_vm14 = vweird.f32 %v1617_v43  ;;  %v1019_v22 = vand.u32 2147483647, %v2194_v42  ;;  %v1021_v23 = vand.u32 2147483648, %v2194_v42 }
 0x18c   : > { %v999_v55 = vadd.f32 %v1613_v27, %v998_v49  ;;  %v787_v56 = vsub.f32 1.0, %v786_v50  ;;  %v1385_v63 = vmul.f32 -1.442695, %v532_v47  ;;  %v778_v5 = vsel %vm2224_vm13, %v2172_v21, %v774_v51  ;;  %vm792_vm15 = vmor %vm790_vm11, %vm791_vm14 }
 0x18d   : > { %v1621_v39 = vpop.eup %1620  ;;  %1626 = vrcp.f32 %v2216_v58  ;;  %v783_v16 = vsel %vm780_vm0, %v782_v10, %v778_v5  ;;  %vm1015_vm2 = vweird.f32 %v2194_v42  ;;  %v811_v31 = vand.u32 2147483648, %v2216_v58 }
 0x18e   : > { %v1003_v2 = vsel %vm1002_vm12, %v1613_v27, %v999_v55  ;;  %v788_v3 = vmul.f32 %v1617_v43, %v787_v56  ;;  %v2236_v6 = vadd.f32 1.0, %v1621_v39  ;;  %1628 = vpow2.f32 %v1385_v63 }
 0x18f   : > { %v497_v0 = vpop.f32.mrf.mxu1  ;;  %v1008_v59 = vsel %vm2198_vm7, %v1007_v53, %v1003_v2  ;;  %v2238_v7 = vpop.eup %1622  ;;  %vm2261_vm3 = vcmp.eq.f32.partialorder %v1019_v22, 8.507059e+37  ;;  %v1022_v35 = vor.u32 1.1754944e-38, %v1021_v23  ;;  %v809_v36 = vand.u32 2147483647, %v2216_v58 }
 0x190   : > { %v1453_v57 = vpack.c.bf16 %v1008_v59, %v993_v4  ;;  %v789_v8 = vadd.f32 %v1617_v43, %v788_v3  ;;  %v1371_v9 = vmul.f32 -1.442695, %v497_v0  ;;  %v1011_v12 = vmul.f32 %v2238_v7, %v2194_v42  ;;  %v1625_v15 = vpop.eup %1624 }
 0x191   : > { %1630 = vrcp.f32 %v2236_v6  ;;  %v2248_v61 = vadd.f32 1.0, %v1625_v15  ;;  %v1034_v38 = vand.u32 2147483647, %v2236_v6  ;;  %vm1016_vm4 = vweird.f32 %v2238_v7 }
 0x192   : > { %1489 = vst [vmem:[%s2065_s26 + $0x50] sm:$0xff] %v1453_v57   ;;  %v793_v14 = vsel %vm792_vm15, %v1617_v43, %v789_v8  ;;  %v1012_v18 = vsub.f32 1.0, %v1011_v12  ;;  %1632 = vpow2.f32 %v1371_v9  ;;  %vm805_vm5 = vweird.f32 %v2216_v58  ;;  %vm2290_vm10 = vmor %vm1015_vm2, %vm1016_vm4 }
 0x193   : > { %v534_v13 = vpop.f32.mrf.mxu3  ;;  %v798_v17 = vsel %vm795_vm1, %v797_v11, %v793_v14  ;;  %v2246_v19 = vpop.eup %1626  ;;  %1634 = vrcp.f32 %v2248_v61  ;;  %v1036_v41 = vand.u32 2147483648, %v2236_v6  ;;  %v812_v48 = vor.u32 1.1754944e-38, %v811_v31 }
 0x194   : > { %v1418_v20 = vpack.c.bf16 %v798_v17, %v783_v16  ;;  %v1386_v21 = vmul.f32 -1.442695, %v534_v13  ;;  %v801_v24 = vmul.f32 %v2246_v19, %v2216_v58  ;;  %v1629_v26 = vpop.eup %1628  ;;  %v1013_v27 = vmul.f32 %v2238_v7, %v1012_v18 }
 0x195   : > { %v2257_v29 = vadd.f32 1.0, %v1629_v26  ;;  %vm1030_vm6 = vweird.f32 %v2236_v6  ;;  %vm2277_vm7 = vcmp.eq.f32.partialorder %v809_v36, 8.507059e+37  ;;  %vm2281_vm9 = vcmp.eq.f32.partialorder %v1034_v38, 8.507059e+37 }
 0x196   : > { %1482 = vst [vmem:[%s2065_s26 + $0x18] sm:$0xff] %v1418_v20   ;;  %v802_v28 = vsub.f32 1.0, %v801_v24  ;;  %1636 = vpow2.f32 %v1386_v21  ;;  %v1014_v43 = vadd.f32 %v2238_v7, %v1013_v27  ;;  %vm806_vm11 = vweird.f32 %v2246_v19 }
 0x197   : > { %v499_v25 = vpop.f32.mrf.mxu1  ;;  %v1631_v30 = vpop.eup %1630  ;;  %1638 = vrcp.f32 %v2257_v29  ;;  %v1037_v39 = vor.u32 1.1754944e-38, %v1036_v41  ;;  %v824_v60 = vand.u32 2147483647, %v2248_v61  ;;  %v826_v2 = vand.u32 2147483648, %v2248_v61  ;;  %vm2316_vm14 = vmor %vm805_vm5, %vm806_vm11 }
 0x198   : > { %v1372_v32 = vmul.f32 -1.442695, %v499_v25  ;;  %v1633_v33 = vpop.eup %1632  ;;  %v1026_v37 = vmul.f32 %v1631_v30, %v2236_v6  ;;  %v803_v44 = vmul.f32 %v2246_v19, %v802_v28  ;;  %vm1031_vm8 = vweird.f32 %v1631_v30 }
 0x199   : > { %v2274_v46 = vadd.f32 1.0, %v1633_v33  ;;  %v1635_v47 = vpop.eup %1634  ;;  %v1018_v62 = vsel %vm2290_vm10, %v2238_v7, %v1014_v43  ;;  %vm1032_vm12 = vmor %vm1030_vm6, %vm1031_vm8  ;;  %vm820_vm15 = vweird.f32 %v2248_v61  ;;  %vm825_vm1 = vcmp.eq.f32.partialorder %v824_v60, 8.507059e+37 }
 0x19a   : > { %v1027_v45 = vsub.f32 1.0, %v1026_v37  ;;  %1640 = vpow2.f32 %v1372_v32  ;;  %v816_v54 = vmul.f32 %v1635_v47, %v2248_v61  ;;  %v804_v63 = vadd.f32 %v2246_v19, %v803_v44 }
 0x19b   : > { %v537_v40 = vpop.f32.mrf.mxu3  ;;  %1642 = vrcp.f32 %v2274_v46  ;;  %vm821_vm13 = vweird.f32 %v1635_v47  ;;  %v1023_v9 = vsel %vm2261_vm3, %v1022_v35, %v1018_v62  ;;  %v827_v58 = vor.u32 1.1754944e-38, %v826_v2 }
 0x19c   : > { %v1387_v49 = vmul.f32 -1.442695, %v537_v40  ;;  %v1637_v50 = vpop.eup %1636  ;;  %v1028_v51 = vmul.f32 %v1631_v30, %v1027_v45  ;;  %v817_v1 = vsub.f32 1.0, %v816_v54  ;;  %v808_v11 = vsel %vm2316_vm14, %v2246_v19, %v804_v63  ;;  %vm822_vm0 = vmor %vm820_vm15, %vm821_vm13 }
 0x19d   : > { %v2301_v42 = vpop.eup %1638  ;;  %v2306_v3 = vadd.f32 1.0, %v1637_v50  ;;  %v1049_v18 = vand.u32 2147483647, %v2257_v29  ;;  %v1051_v20 = vand.u32 2147483648, %v2257_v29  ;;  %v813_v22 = vsel %vm2277_vm7, %v812_v48, %v808_v11 }
 0x19e   : > { %v1029_v0 = vadd.f32 %v1631_v30, %v1028_v51  ;;  %1644 = vpow2.f32 %v1387_v49  ;;  %v818_v59 = vmul.f32 %v1635_v47, %v817_v1  ;;  %v1041_v7 = vmul.f32 %v2301_v42, %v2257_v29 }
 0x19f   : > { %v502_v55 = vpop.f32.mrf.mxu1  ;;  %1646 = vrcp.f32 %v2306_v3  ;;  %v841_v27 = vand.u32 2147483648, %v2274_v46  ;;  %vm1045_vm2 = vweird.f32 %v2257_v29  ;;  %vm2345_vm3 = vcmp.eq.f32.partialorder %v1049_v18, 8.507059e+37 }
 0x1a0   : > { %v1373_v4 = vmul.f32 -1.442695, %v502_v55  ;;  %v1033_v5 = vsel %vm1032_vm12, %v1631_v30, %v1029_v0  ;;  %v1641_v8 = vpop.eup %1640  ;;  %v819_v13 = vadd.f32 %v1635_v47, %v818_v59  ;;  %v1042_v14 = vsub.f32 1.0, %v1041_v7 }
 0x1a1   : > { %v1038_v10 = vsel %vm2281_vm9, %v1037_v39, %v1033_v5  ;;  %v2327_v15 = vpop.eup %1642  ;;  %v2329_v16 = vadd.f32 1.0, %v1641_v8  ;;  %v1052_v33 = vor.u32 1.1754944e-38, %v1051_v20  ;;  %vm835_vm4 = vweird.f32 %v2274_v46 }
 0x1a2   : > { %v1458_v12 = vpack.c.bf16 %v1038_v10, %v1023_v9  ;;  %1648 = vpow2.f32 %v1373_v4  ;;  %v823_v17 = vsel %vm822_vm0, %v1635_v47, %v819_v13  ;;  %v831_v19 = vmul.f32 %v2327_v15, %v2274_v46 }
 0x1a3   : > { %v539_v57 = vpop.f32.mrf.mxu3  ;;  %v828_v23 = vsel %vm825_vm1, %v827_v58, %v823_v17  ;;  %1650 = vrcp.f32 %v2329_v16  ;;  %v1043_v25 = vmul.f32 %v2301_v42, %v1042_v14  ;;  %v839_v34 = vand.u32 2147483647, %v2274_v46 }
 0x1a4   : > { %1490 = vst [vmem:[%s2065_s26 + $0x58] sm:$0xff] %v1458_v12   ;;  %v1645_v21 = vpop.eup %1644  ;;  %v1423_v24 = vpack.c.bf16 %v828_v23, %v813_v22  ;;  %v832_v26 = vsub.f32 1.0, %v831_v19  ;;  %v1388_v31 = vmul.f32 -1.442695, %v539_v57  ;;  %vm1046_vm5 = vweird.f32 %v2301_v42 }
 0x1a5   : > { %v1647_v28 = vpop.eup %1646  ;;  %v2342_v30 = vadd.f32 1.0, %v1645_v21  ;;  %v1064_v38 = vand.u32 2147483647, %v2306_v3  ;;  %v1066_v40 = vand.u32 2147483648, %v2306_v3  ;;  %v1044_v41 = vadd.f32 %v2301_v42, %v1043_v25  ;;  %vm2367_vm9 = vmor %vm1045_vm2, %vm1046_vm5 }
 0x1a6   : > { %1483 = vst [vmem:[%s2065_s26 + $0x20] sm:$0xff] %v1423_v24   ;;  %v1056_v35 = vmul.f32 %v1647_v28, %v2306_v3  ;;  %v833_v43 = vmul.f32 %v2327_v15, %v832_v26  ;;  %v842_v44 = vor.u32 1.1754944e-38, %v841_v27  ;;  %vm1060_vm6 = vweird.f32 %v2306_v3 }
 0x1a7   : > { %v504_v61 = vpop.f32.mrf.mxu1  ;;  %1652 = vrcp.f32 %v2342_v30  ;;  %vm836_vm7 = vweird.f32 %v2327_v15  ;;  %vm1061_vm8 = vweird.f32 %v1647_v28  ;;  %vm2371_vm10 = vcmp.eq.f32.partialorder %v1064_v38, 8.507059e+37 }
 0x1a8   : > { %v1649_v37 = vpop.eup %1648  ;;  %v1057_v45 = vsub.f32 1.0, %v1056_v35  ;;  %1654 = vpow2.f32 %v1388_v31  ;;  %v1374_v49 = vmul.f32 -1.442695, %v504_v61  ;;  %v1067_v55 = vor.u32 1.1754944e-38, %v1066_v40  ;;  %vm1062_vm11 = vmor %vm1060_vm6, %vm1061_vm8 }
 0x1a9   : > { %v1651_v47 = vpop.eup %1650  ;;  %v2359_v48 = vadd.f32 1.0, %v1649_v37  ;;  %v854_v56 = vand.u32 2147483647, %v2329_v16  ;;  %v1048_v39 = vsel %vm2367_vm9, %v2301_v42, %v1044_v41  ;;  %v834_v60 = vadd.f32 %v2327_v15, %v833_v43  ;;  %vm2394_vm13 = vmor %vm835_vm4, %vm836_vm7 }
 0x1aa   : > { %v1058_v50 = vmul.f32 %v1647_v28, %v1057_v45  ;;  %v846_v52 = vmul.f32 %v1651_v47, %v2329_v16  ;;  %v856_v0 = vand.u32 2147483648, %v2329_v16  ;;  %vm851_vm12 = vweird.f32 %v1651_v47 }
 0x1ab   : > { %v542_v36 = vpop.f32.mrf.mxu3  ;;  %1656 = vrcp.f32 %v2359_v48  ;;  %v1053_v57 = vsel %vm2345_vm3, %v1052_v33, %v1048_v39  ;;  %vm850_vm14 = vweird.f32 %v2329_v16  ;;  %v838_v9 = vsel %vm2394_vm13, %v2327_v15, %v834_v60 }
 0x1ac   : > { %v1059_v29 = vadd.f32 %v1647_v28, %v1058_v50  ;;  %v847_v62 = vsub.f32 1.0, %v846_v52  ;;  %1658 = vpow2.f32 %v1374_v49  ;;  %v1389_v1 = vmul.f32 -1.442695, %v542_v36  ;;  %vm852_vm15 = vmor %vm850_vm14, %vm851_vm12 }
 0x1ad   : > { %v2381_v63 = vpop.eup %1652  ;;  %v857_v12 = vor.u32 1.1754944e-38, %v856_v0  ;;  %vm840_vm0 = vcmp.eq.f32.partialorder %v839_v34, 8.507059e+37  ;;  %vm855_vm1 = vcmp.eq.f32.partialorder %v854_v56, 8.507059e+37  ;;  %v1079_v61 = vand.u32 2147483647, %v2342_v30 }
 0x1ae   : > { %v1063_v4 = vsel %vm1062_vm11, %v1647_v28, %v1059_v29  ;;  %v848_v5 = vmul.f32 %v1651_v47, %v847_v62  ;;  %v1071_v42 = vmul.f32 %v2381_v63, %v2342_v30  ;;  %v1655_v7 = vpop.eup %1654  ;;  %1660 = vpow2.f32 %v1389_v1 }
 0x1af   : > { %v507_v51 = vpop.f32.mrf.mxu1  ;;  %v1068_v8 = vsel %vm2371_vm10, %v1067_v55, %v1063_v4  ;;  %v2404_v11 = vadd.f32 1.0, %v1655_v7  ;;  %v843_v18 = vsel %vm840_vm0, %v842_v44, %v838_v9  ;;  %v1081_v24 = vand.u32 2147483648, %v2342_v30 }
 0x1b0   : > { %v1375_v2 = vmul.f32 -1.442695, %v507_v51  ;;  %v1463_v6 = vpack.c.bf16 %v1068_v8, %v1053_v57  ;;  %v849_v10 = vadd.f32 %v1651_v47, %v848_v5  ;;  %v1072_v13 = vsub.f32 1.0, %v1071_v42 }
 0x1b1   : > { %v2406_v46 = vpop.eup %1656  ;;  %vm1075_vm2 = vweird.f32 %v2342_v30  ;;  %vm2422_vm3 = vcmp.eq.f32.partialorder %v1079_v61, 8.507059e+37  ;;  %v871_v31 = vand.u32 2147483648, %v2359_v48  ;;  %vm1076_vm4 = vweird.f32 %v2381_v63 }
 0x1b2   : > { %1662 = vpow2.f32 %v1375_v2  ;;  %1491 = vst [vmem:[%s2065_s26 + $0x60] sm:$0xff] %v1463_v6   ;;  %v853_v58 = vsel %vm852_vm15, %v1651_v47, %v849_v10  ;;  %v1659_v17 = vpop.eup %1658  ;;  %v861_v20 = vmul.f32 %v2406_v46, %v2359_v48  ;;  %v1073_v22 = vmul.f32 %v2381_v63, %v1072_v13  ;;  %vm2441_vm6 = vmor %vm1075_vm2, %vm1076_vm4 }
 0x1b3   : > { %v544_v59 = vpop.f32.mrf.mxu3  ;;  %v858_v15 = vsel %vm855_vm1, %v857_v12, %v853_v58  ;;  %1664 = vrcp.f32 %v2404_v11  ;;  %v2414_v23 = vadd.f32 1.0, %v1659_v17  ;;  %v1082_v37 = vor.u32 1.1754944e-38, %v1081_v24 }
 0x1b4   : > { %v1390_v14 = vmul.f32 -1.442695, %v544_v59  ;;  %v1428_v19 = vpack.c.bf16 %v858_v15, %v843_v18  ;;  %v1661_v21 = vpop.eup %1660  ;;  %v862_v27 = vsub.f32 1.0, %v861_v20  ;;  %v1074_v34 = vadd.f32 %v2381_v63, %v1073_v22 }
 0x1b5   : > { %v2418_v25 = vadd.f32 1.0, %v1661_v21  ;;  %v869_v38 = vand.u32 2147483647, %v2359_v48  ;;  %v1094_v41 = vand.u32 2147483647, %v2404_v11  ;;  %vm865_vm5 = vweird.f32 %v2359_v48 }
 0x1b6   : > { %1666 = vpow2.f32 %v1390_v14  ;;  %1484 = vst [vmem:[%s2065_s26 + $0x28] sm:$0xff] %v1428_v19   ;;  %v863_v45 = vmul.f32 %v2406_v46, %v862_v27  ;;  %v1096_v47 = vand.u32 2147483648, %v2404_v11  ;;  %vm866_vm7 = vweird.f32 %v2406_v46 }
 0x1b7   : > { %v509_v16 = vpop.f32.mrf.mxu1  ;;  %1668 = vrcp.f32 %v2414_v23  ;;  %v872_v50 = vor.u32 1.1754944e-38, %v871_v31  ;;  %vm1090_vm8 = vweird.f32 %v2404_v11  ;;  %v1078_v53 = vsel %vm2441_vm6, %v2381_v63, %v1074_v34  ;;  %vm2479_vm13 = vmor %vm865_vm5, %vm866_vm7 }
 0x1b8   : > { %v1663_v26 = vpop.eup %1662  ;;  %1670 = vrcp.f32 %v2418_v25  ;;  %v1376_v36 = vmul.f32 -1.442695, %v509_v16  ;;  %vm2454_vm9 = vcmp.eq.f32.partialorder %v869_v38, 8.507059e+37  ;;  %vm2458_vm11 = vcmp.eq.f32.partialorder %v1094_v41, 8.507059e+37 }
 0x1b9   : > { %v1665_v33 = vpop.eup %1664  ;;  %v2430_v35 = vadd.f32 1.0, %v1663_v26  ;;  %v864_v62 = vadd.f32 %v2406_v46, %v863_v45  ;;  %v1097_v63 = vor.u32 1.1754944e-38, %v1096_v47  ;;  %v1083_v1 = vsel %vm2422_vm3, %v1082_v37, %v1078_v53 }
 0x1ba   : > { %v1086_v40 = vmul.f32 %v1665_v33, %v2404_v11  ;;  %vm1091_vm10 = vweird.f32 %v1665_v33  ;;  %v884_v5 = vand.u32 2147483647, %v2414_v23  ;;  %v886_v59 = vand.u32 2147483648, %v2414_v23 }
 0x1bb   : > { %v547_v32 = vpop.f32.mrf.mxu3  ;;  %1672 = vrcp.f32 %v2430_v35  ;;  %vm1092_vm12 = vmor %vm1090_vm8, %vm1091_vm10  ;;  %vm880_vm14 = vweird.f32 %v2414_v23  ;;  %v868_v11 = vsel %vm2479_vm13, %v2406_v46, %v864_v62  ;;  %vm1105_vm0 = vweird.f32 %v2418_v25 }
 0x1bc   : > { %v1667_v44 = vpop.eup %1666  ;;  %v1087_v52 = vsub.f32 1.0, %v1086_v40  ;;  %1674 = vpow2.f32 %v1376_v36  ;;  %v1391_v55 = vmul.f32 -1.442695, %v547_v32  ;;  %vm885_vm2 = vcmp.eq.f32.partialorder %v884_v5, 8.507059e+37 }
 0x1bd   : > { %v1669_v51 = vpop.eup %1668  ;;  %v2450_v54 = vadd.f32 1.0, %v1667_v44  ;;  %v887_v15 = vor.u32 1.1754944e-38, %v886_v59  ;;  %v1109_v19 = vand.u32 2147483647, %v2418_v25  ;;  %v1111_v32 = vand.u32 2147483648, %v2418_v25 }
 0x1be   : > { %v2452_v30 = vpop.eup %1670  ;;  %v1088_v39 = vmul.f32 %v1665_v33, %v1087_v52  ;;  %v876_v29 = vmul.f32 %v1669_v51, %v2414_v23  ;;  %vm881_vm15 = vweird.f32 %v1669_v51  ;;  %v873_v23 = vsel %vm2454_vm9, %v872_v50, %v868_v11 }
 0x1bf   : > { %v512_v43 = vpop.f32.mrf.mxu1  ;;  %v1101_v0 = vmul.f32 %v2452_v30, %v2418_v25  ;;  %1676 = vrcp.f32 %v2450_v54  ;;  %vm882_vm1 = vmor %vm880_vm14, %vm881_vm15  ;;  %vm1106_vm3 = vweird.f32 %v2452_v30  ;;  %v1124_v37 = vand.u32 2147483647, %v2450_v54 }
 0x1c0   : > { %v1089_v2 = vadd.f32 %v1665_v33, %v1088_v39  ;;  %v877_v4 = vsub.f32 1.0, %v876_v29  ;;  %1678 = vpow2.f32 %v1391_v55  ;;  %v1377_v57 = vmul.f32 -1.442695, %v512_v43  ;;  %vm2513_vm5 = vmor %vm1105_vm0, %vm1106_vm3 }
 0x1c1   : > { %v2470_v42 = vpop.eup %1672  ;;  %v1102_v7 = vsub.f32 1.0, %v1101_v0  ;;  %vm1120_vm6 = vweird.f32 %v2450_v54  ;;  %vm1110_vm7 = vcmp.eq.f32.partialorder %v1109_v19, 8.507059e+37  ;;  %v1112_v47 = vor.u32 1.1754944e-38, %v1111_v32 }
 0x1c2   : > { %v1093_v8 = vsel %vm1092_vm12, %v1665_v33, %v1089_v2  ;;  %v878_v9 = vmul.f32 %v1669_v51, %v877_v4  ;;  %v1675_v10 = vpop.eup %1674  ;;  %v891_v48 = vmul.f32 %v2470_v42, %v2430_v35  ;;  %1680 = vpow2.f32 %v1377_v57 }
 0x1c3   : > { %v549_v6 = vpop.f32.mrf.mxu3  ;;  %v1098_v12 = vsel %vm2458_vm11, %v1097_v63, %v1093_v8  ;;  %v1103_v16 = vmul.f32 %v2452_v30, %v1102_v7  ;;  %v2493_v17 = vadd.f32 1.0, %v1675_v10  ;;  %v1126_v33 = vand.u32 2147483648, %v2450_v54 }
 0x1c4   : > { %v1468_v14 = vpack.c.bf16 %v1098_v12, %v1083_v1  ;;  %v879_v58 = vadd.f32 %v1669_v51, %v878_v9  ;;  %v1392_v46 = vmul.f32 -1.442695, %v549_v6  ;;  %v892_v28 = vsub.f32 1.0, %v891_v48 }
 0x1c5   : > { %v1677_v18 = vpop.eup %1676  ;;  %1682 = vrcp.f32 %v2493_v17  ;;  %v1104_v27 = vadd.f32 %v2452_v30, %v1103_v16  ;;  %v1127_v25 = vor.u32 1.1754944e-38, %v1126_v33  ;;  %vm895_vm9 = vweird.f32 %v2430_v35 }
 0x1c6   : > { %1492 = vst [vmem:[%s2065_s26 + $0x68] sm:$0xff] %v1468_v14   ;;  %v883_v20 = vsel %vm882_vm1, %v1669_v51, %v879_v58  ;;  %v1116_v61 = vmul.f32 %v1677_v18, %v2450_v54  ;;  %v1679_v22 = vpop.eup %1678  ;;  %1684 = vpow2.f32 %v1392_v46  ;;  %vm1121_vm4 = vweird.f32 %v1677_v18 }
 0x1c7   : > { %v514_v13 = vpop.f32.mrf.mxu1  ;;  %v888_v24 = vsel %vm885_vm2, %v887_v15, %v883_v20  ;;  %v2505_v34 = vadd.f32 1.0, %v1679_v22  ;;  %v1108_v41 = vsel %vm2513_vm5, %v2452_v30, %v1104_v27  ;;  %v893_v43 = vmul.f32 %v2470_v42, %v892_v28  ;;  %vm1122_vm8 = vmor %vm1120_vm6, %vm1121_vm4 }
 0x1c8   : > { %v1378_v21 = vmul.f32 -1.442695, %v514_v13  ;;  %v1433_v26 = vpack.c.bf16 %v888_v24, %v873_v23  ;;  %v1117_v31 = vsub.f32 1.0, %v1116_v61  ;;  %v1681_v38 = vpop.eup %1680  ;;  %vm1125_vm10 = vcmp.eq.f32.partialorder %v1124_v37, 8.507059e+37 }
 0x1c9   : > { %v2523_v49 = vadd.f32 1.0, %v1681_v38  ;;  %v1113_v53 = vsel %vm1110_vm7, %v1112_v47, %v1108_v41  ;;  %v899_v55 = vand.u32 2147483647, %v2430_v35  ;;  %v894_v56 = vadd.f32 %v2470_v42, %v893_v43 }
 0x1ca   : > { %1485 = vst [vmem:[%s2065_s26 + $0x30] sm:$0xff] %v1433_v26   ;;  %v1118_v36 = vmul.f32 %v1677_v18, %v1117_v31  ;;  %1686 = vpow2.f32 %v1378_v21  ;;  %vm896_vm11 = vweird.f32 %v2470_v42  ;;  %v901_v62 = vand.u32 2147483648, %v2430_v35 }
 0x1cb   : > { %1688 = vrcp.f32 %v2505_v34  ;;  %v1683_v45 = vpop.eup %1682  ;;  %v916_v63 = vand.u32 2147483648, %v2493_v17  ;;  %v914_v4 = vand.u32 2147483647, %v2493_v17  ;;  %vm2545_vm13 = vmor %vm895_vm9, %vm896_vm11  ;;  %vm910_vm14 = vweird.f32 %v2493_v17 }
 0x1cc   : > { %v1119_v44 = vadd.f32 %v1677_v18, %v1118_v36  ;;  %v906_v52 = vmul.f32 %v1683_v45, %v2493_v17  ;;  %v1685_v51 = vpop.eup %1684  ;;  %1690 = vrcp.f32 %v2523_v49  ;;  %vm911_vm12 = vweird.f32 %v1683_v45 }
 0x1cd   : > { %v2535_v0 = vadd.f32 1.0, %v1685_v51  ;;  %v898_v7 = vsel %vm2545_vm13, %v2470_v42, %v894_v56  ;;  %v902_v9 = vor.u32 1.1754944e-38, %v901_v62  ;;  %vm912_vm15 = vmor %vm910_vm14, %vm911_vm12  ;;  %v917_v35 = vor.u32 1.1754944e-38, %v916_v63 }
 0x1ce   : > { %v1123_v50 = vsel %vm1122_vm8, %v1677_v18, %v1119_v44  ;;  %v907_v60 = vsub.f32 1.0, %v906_v52  ;;  %vm900_vm0 = vcmp.eq.f32.partialorder %v899_v55, 8.507059e+37  ;;  %vm915_vm1 = vcmp.eq.f32.partialorder %v914_v4, 8.507059e+37 }
 0x1cf   : > { %v1128_v30 = vsel %vm1125_vm10, %v1127_v25, %v1123_v50  ;;  %1692 = vrcp.f32 %v2535_v0  ;;  %v903_v11 = vsel %vm900_vm0, %v902_v9, %v898_v7  ;;  %v1139_v42 = vand.u32 2147483647, %v2505_v34 }
 0x1d0   : > { %v1687_v54 = vpop.eup %1686  ;;  %v1473_v39 = vpack.c.bf16 %v1128_v30, %v1113_v53  ;;  %v908_v2 = vmul.f32 %v1683_v45, %v907_v60  ;;  %v1141_v48 = vand.u32 2147483648, %v2505_v34  ;;  %vm1135_vm2 = vweird.f32 %v2505_v34 }
 0x1d1   : > { %v2531_v29 = vpop.eup %1688  ;;  %v2537_v1 = vadd.f32 1.0, %v1687_v54  ;;  %vm2566_vm3 = vcmp.eq.f32.partialorder %v1139_v42, 8.507059e+37  ;;  %v929_v19 = vand.u32 2147483647, %v2523_v49  ;;  %v931_v22 = vand.u32 2147483648, %v2523_v49 }
 0x1d2   : > { %1493 = vst [vmem:[%s2065_s26 + $0x70] sm:$0xff] %v1473_v39   ;;  %v1131_v5 = vmul.f32 %v2531_v29, %v2505_v34  ;;  %v909_v57 = vadd.f32 %v1683_v45, %v908_v2  ;;  %v2555_v8 = vpop.eup %1690  ;;  %v1142_v20 = vor.u32 1.1754944e-38, %v1141_v48  ;;  %vm1136_vm4 = vweird.f32 %v2531_v29 }
 0x1d3   : > { %1694 = vrcp.f32 %v2537_v1  ;;  %v921_v10 = vmul.f32 %v2555_v8, %v2523_v49  ;;  %vm926_vm5 = vweird.f32 %v2555_v8  ;;  %v1156_v26 = vand.u32 2147483648, %v2535_v0  ;;  %vm2588_vm7 = vmor %vm1135_vm2, %vm1136_vm4 }
 0x1d4   : > { %v1132_v3 = vsub.f32 1.0, %v1131_v5  ;;  %v913_v6 = vsel %vm912_vm15, %v1683_v45, %v909_v57  ;;  %v1154_v31 = vand.u32 2147483647, %v2535_v0  ;;  %v946_v32 = vand.u32 2147483648, %v2537_v1 }
 0x1d5   : > { %v918_v12 = vsel %vm915_vm1, %v917_v35, %v913_v6  ;;  %v922_v58 = vsub.f32 1.0, %v921_v10  ;;  %v1693_v16 = vpop.eup %1692  ;;  %vm925_vm8 = vweird.f32 %v2523_v49  ;;  %v944_v37 = vand.u32 2147483647, %v2537_v1 }
 0x1d6   : > { %v1438_v13 = vpack.c.bf16 %v918_v12, %v903_v11  ;;  %v1133_v14 = vmul.f32 %v2531_v29, %v1132_v3  ;;  %v1146_v15 = vmul.f32 %v1693_v16, %v2535_v0  ;;  %vm1151_vm6 = vweird.f32 %v1693_v16  ;;  %vm2597_vm10 = vmor %vm925_vm8, %vm926_vm5 }
 0x1d7   : > { %v923_v18 = vmul.f32 %v2555_v8, %v922_v58  ;;  %vm2601_vm11 = vcmp.eq.f32.partialorder %v929_v19, 8.507059e+37  ;;  %vm1150_vm12 = vweird.f32 %v2535_v0  ;;  %v1157_v44 = vor.u32 1.1754944e-38, %v1156_v26 }
 0x1d8   : > { %1486 = vst [vmem:[%s2065_s26 + $0x38] sm:$0xff] %v1438_v13   ;;  %v1134_v21 = vadd.f32 %v2531_v29, %v1133_v14  ;;  %v1147_v23 = vsub.f32 1.0, %v1146_v15  ;;  %vm1152_vm13 = vmor %vm1150_vm12, %vm1151_vm6  ;;  %vm940_vm14 = vweird.f32 %v2537_v1  ;;  %v932_v47 = vor.u32 1.1754944e-38, %v931_v22 }
 0x1d9   : > { %v1695_v17 = vpop.eup %1694  ;;  %v924_v24 = vadd.f32 %v2555_v8, %v923_v18  ;;  %vm1155_vm15 = vcmp.eq.f32.partialorder %v1154_v31, 8.507059e+37  ;;  %v947_v49 = vor.u32 1.1754944e-38, %v946_v32  ;;  %vm945_vm1 = vcmp.eq.f32.partialorder %v944_v37, 8.507059e+37 }
 0x1da   : > { %v936_v61 = vmul.f32 %v1695_v17, %v2537_v1  ;;  %v1148_v28 = vmul.f32 %v1693_v16, %v1147_v23  ;;  %vm941_vm9 = vweird.f32 %v1695_v17  ;;  %v1138_v38 = vsel %vm2588_vm7, %v2531_v29, %v1134_v21 }
 0x1db   : > { %v928_v43 = vsel %vm2597_vm10, %v2555_v8, %v924_v24  ;;  %vm942_vm0 = vmor %vm940_vm14, %vm941_vm9  ;;  %v1143_v50 = vsel %vm2566_vm3, %v1142_v20, %v1138_v38 }
 0x1dc   : > { %v937_v27 = vsub.f32 1.0, %v936_v61  ;;  %v1149_v41 = vadd.f32 %v1693_v16, %v1148_v28  ;;  %v933_v53 = vsel %vm2601_vm11, %v932_v47, %v928_v43 }
 0x1de   : > { %v938_v36 = vmul.f32 %v1695_v17, %v937_v27  ;;  %v1153_v25 = vsel %vm1152_vm13, %v1693_v16, %v1149_v41 }
 0x1df   : > { %v1158_v52 = vsel %vm1155_vm15, %v1157_v44, %v1153_v25 }
 0x1e0   : > { %v939_v45 = vadd.f32 %v1695_v17, %v938_v36  ;;  %v1478_v55 = vpack.c.bf16 %v1158_v52, %v1143_v50 }
 0x1e2   : > { %v943_v51 = vsel %vm942_vm0, %v1695_v17, %v939_v45  ;;  %1494 = vst [vmem:[%s2065_s26 + $0x78] sm:$0xff] %v1478_v55  }
 0x1e3   : > { %v948_v30 = vsel %vm945_vm1, %v947_v49, %v943_v51 }
 0x1e4   : > { %v1443_v54 = vpack.c.bf16 %v948_v30, %v933_v53 }
 0x1e6   : > { %1487 = vst [vmem:[%s2065_s26 + $0x40] sm:$0xff] %v1443_v54  }
 0x1e7   : > { %1813 = shalt.err (!%p1810_p8)
}
 0x1e8   : > { %s1862_s27 = smov 64   ;;  %s1863_s30 = smov 4  }
 0x1e9   : > { %1507 = dma.vmem_to_hbm [thread:$0]  (%p1936_p11), %s1238_s22, 2048, %s1240_s6, %s1225_s7, %s1862_s27, %s1862_s27, %s1863_s30  }
 0x1ea PF: > { %s1254_s4 = sand.u32 1, %s1844_s12   ;;  %p2721_p9 = scmp.ge.s32.totalorder %s1856_s15, 2 }
 0x1eb   : > { %s1255_s23 = scalar_lea.sflag [#allocation4], %s1254_s4 }
 0x1ec   : > { %p1521_p10 = pnand %p2721_p9, %p1940_p12 }
 0x1ee   : > { %p1522_p1 = pneg %p1521_p10 }
 0x1f0   : > { %1839 = dma.done.wait (%p1522_p1), %s1255_s23, 2048  }
 0x1f1   : > { %1841 = vsyncadd (%p1522_p1), %s1255_s23, 4294965248  ;;  %p17_p2 = scmp.ge.s32.totalorder %s1909_s18, 4   ;;  %s2722_s12 = smov %s1848_s13 }
 0x1f2   : > { %s2723_s13 = smov %s1852_s14  ;;  %s2724_s14 = smov %s1921_s21 }
 0x1f3   : > { %s2725_s15 = smov %s1909_s18  ;;  %19 = sbr.rel (!%p17_p2) target bundleno = 6 (0x6), region = 85 }
 0x1f8   :  { %1261 = vsyncpa [#allocation3], 1 }
 0x1f9   :  { %1263 = vsyncpa [#allocation3 + $0x1], 1 }
 0x1fa   :  { %1264 = vsyncpa [#allocation6], 1 }
 0x1fb   :  { %1265 = vsyncpa [#allocation4], 1 }
 0x1fc   :  { %1267 = vsyncpa [#allocation4 + $0x1], 1 }

</bundles_post_ra>
